<compile_context>
chip_gen: v7x
topology: tpu7x:2x2x1
jax: 0.10.0
libtpu: 0.0.40
codegen_flags: <defaults>
</compile_context>

<pallas_src>
import functools

import jax
import jax.numpy as jnp
import numpy as np
from jax.experimental import pallas as pl
from jax.experimental.pallas import tpu as pltpu

STATE_SIZE = 4      # CartPole-v1 observation_space.shape[0]
HIDDEN = 128
CHUNK = 128         # lane width of one inner-loop chunk (one output vreg row)


def _round_up(x, m):
    return ((x + m - 1) // m) * m


def critic_kernel(xT_ref, w1b_ref, b1b_ref, w2b_ref, b2_ref, o_ref):
    """Feature-major Critic forward.

    xT_ref : (STATE_SIZE, TB)            transposed state tile (batch on lanes)
    w1b_ref: (STATE_SIZE, HIDDEN, CHUNK) w1^T columns pre-broadcast to lane width
    b1b_ref: (HIDDEN, CHUNK)             b1 pre-broadcast to lane width
    w2b_ref: (HIDDEN, CHUNK)             w2 column pre-broadcast to lane width
    b2_ref : (1,) f32 in SMEM            output bias scalar
    o_ref  : (1, TB)                     lane-dense value output (v^T)
    """
    tb = o_ref.shape[1]
    n_chunks = tb // CHUNK
    b2 = b2_ref[0]

    def chunk_body(c, carry):
        start = pl.multiple_of(c * CHUNK, CHUNK)
        cols = pl.ds(start, CHUNK)
        xc = xT_ref[:, cols]                                   # (STATE_SIZE, CHUNK)
        # Layer 1 (Linear(4,128) + ReLU): h^T[i,j] = sum_k w1[k,i] * x[j,k].
        # Weight operands are already lane-broadcast (wrapper); only the 4
        # cheap sublane broadcasts of the x rows happen per chunk.
        h = w1b_ref[0] * jnp.broadcast_to(xc[0:1, :], (HIDDEN, CHUNK))
        for k in range(1, STATE_SIZE):
            h = h + w1b_ref[k] * jnp.broadcast_to(xc[k:k + 1, :], (HIDDEN, CHUNK))
        h = jnp.maximum(h + b1b_ref[...], 0.0)                 # (HIDDEN, CHUNK)
        # Layer 2 (Linear(128,1)): VPU multiply + cross-vreg/sublane reduction
        # over the hidden axis -> one lane-dense (1, CHUNK) row of values.
        v = jnp.sum(h * w2b_ref[...], axis=0, keepdims=True) + b2
        o_ref[:, cols] = v.astype(o_ref.dtype)
        return carry

    jax.lax.fori_loop(0, n_chunks, chunk_body, 0, unroll=(n_chunks <= 8))


@functools.partial(jax.jit, static_argnames=("block_cols",))
def critic_forward(state, w1, b1, w2, b2, *, block_cols=4096):
    """state: (B, STATE_SIZE) f32 -> (B, 1) f32 (same semantics as nn.Sequential)."""
    assert state.ndim == 2 and state.shape[1] == STATE_SIZE
    assert w1.shape == (STATE_SIZE, HIDDEN)
    assert b1.shape == (HIDDEN,)
    assert w2.shape == (HIDDEN, 1)   # guards the reshape-as-transpose below
    assert b2.shape == (1,)

    B = state.shape[0]
    B_pad = _round_up(max(B, CHUNK), CHUNK)
    # >=2 grid steps only for large batches (engages both v7x TensorCores on
    # the "parallel" axis); one step otherwise (per-step overhead dominates).
    min_steps = 2 if B_pad >= 2048 else 1
    TB = min(block_cols, _round_up(-(-B_pad // min_steps), CHUNK))
    B_pad = _round_up(B_pad, TB)

    # Layout plumbing in the wrapper: lane-dense (4, B_pad) state, weights
    # pre-broadcast to lane width so the kernel body is broadcast-free.
    xT = jnp.pad(state, ((0, B_pad - B), (0, 0))).T                     # (4, B_pad)
    w1b = jnp.broadcast_to(w1[:, :, None], (STATE_SIZE, HIDDEN, CHUNK))  # (4,128,128)
    b1b = jnp.broadcast_to(b1.reshape(HIDDEN, 1), (HIDDEN, CHUNK))       # (128,128)
    w2b = jnp.broadcast_to(w2.reshape(HIDDEN, 1), (HIDDEN, CHUNK))       # (128,128)

    out_t = pl.pallas_call(
        critic_kernel,
        out_shape=jax.ShapeDtypeStruct((1, B_pad), jnp.float32),
        grid=(B_pad // TB,),
        in_specs=[
            pl.BlockSpec((STATE_SIZE, TB), lambda i: (0, i)),            # state tiles (pipelined)
            pl.BlockSpec((STATE_SIZE, HIDDEN, CHUNK), lambda i: (0, 0, 0)),  # w1^T bcast, resident
            pl.BlockSpec((HIDDEN, CHUNK), lambda i: (0, 0)),             # b1 bcast, resident
            pl.BlockSpec((HIDDEN, CHUNK), lambda i: (0, 0)),             # w2 bcast, resident
            pl.BlockSpec(memory_space=pltpu.MemorySpace.SMEM),           # b2 scalar in SMEM
        ],
        out_specs=pl.BlockSpec((1, TB), lambda i: (0, i)),               # lane-dense output
        compiler_params=pltpu.CompilerParams(
            dimension_semantics=("parallel",)),
    )(xT, w1b, b1b, w2b, b2)

    # Padded columns hold relu(b1)·w2 + b2 garbage; slice them off here.
    return out_t[0, :B].reshape(B, 1)


def init_params(key):
    # Mimics PyTorch nn.Linear default init: U(-1/sqrt(fan_in), +1/sqrt(fan_in)).
    k1, k2, k3, k4 = jax.random.split(key, 4)
    bound1 = 1.0 / np.sqrt(STATE_SIZE)
    bound2 = 1.0 / np.sqrt(HIDDEN)
    w1 = jax.random.uniform(k1, (STATE_SIZE, HIDDEN), jnp.float32, -bound1, bound1)
    b1 = jax.random.uniform(k2, (HIDDEN,), jnp.float32, -bound1, bound1)
    w2 = jax.random.uniform(k3, (HIDDEN, 1), jnp.float32, -bound2, bound2)
    b2 = jax.random.uniform(k4, (1,), jnp.float32, -bound2, bound2)
    return w1, b1, w2, b2


def reference_forward(state, w1, b1, w2, b2):
    h = jnp.maximum(state @ w1 + b1, 0.0)
    return h @ w2 + b2


if __name__ == "__main__":
    key = jax.random.PRNGKey(0)
    pkey, xkey1, xkey2 = jax.random.split(key, 3)
    w1, b1, w2, b2 = init_params(pkey)

    # Small batch (single chunk, single grid step).
    state8 = jax.random.normal(xkey1, (8, STATE_SIZE), jnp.float32)
    out8 = jax.block_until_ready(critic_forward(state8, w1, b1, w2, b2))
    ref8 = reference_forward(state8, w1, b1, w2, b2)
    np.testing.assert_allclose(np.asarray(out8), np.asarray(ref8), rtol=1e-5, atol=1e-5)
    assert out8.shape == (8, 1)

    # Ragged batch spanning two inner chunks (exercises padding + chunk loop).
    state200 = jax.random.normal(xkey2, (200, STATE_SIZE), jnp.float32)
    out200 = jax.block_until_ready(critic_forward(state200, w1, b1, w2, b2))
    ref200 = reference_forward(state200, w1, b1, w2, b2)
    np.testing.assert_allclose(np.asarray(out200), np.asarray(ref200), rtol=1e-5, atol=1e-5)
    assert out200.shape == (200, 1)

    print("KERNEL_OK")
</pallas_src>

<mosaic_0001>
module attributes {stable_mosaic.version = 11 : i64} {
  func.func @critic_kernel(%arg0: i32, %arg1: memref<4x128xf32, #tpu.memory_space<vmem>>, %arg2: memref<4x128x128xf32, #tpu.memory_space<vmem>>, %arg3: memref<128x128xf32, #tpu.memory_space<vmem>>, %arg4: memref<128x128xf32, #tpu.memory_space<vmem>>, %arg5: memref<1xf32, #tpu.memory_space<smem>>, %arg6: memref<1x128xf32, #tpu.memory_space<vmem>>) attributes {dimension_semantics = [#tpu.dimension_semantics<parallel>], iteration_bounds = array<i64: 1>, scalar_prefetch = 0 : i64, scratch_operands = 0 : i64, tpu.core_type = #tpu.core_type<tc>, window_params = [{transform_indices = @transform_0, window_bounds = array<i64: 4, 128>}, {pipeline_mode = #tpu.pipeline_mode<synchronous>, transform_indices = @transform_1, window_bounds = array<i64: 4, 128, 128>}, {pipeline_mode = #tpu.pipeline_mode<synchronous>, transform_indices = @transform_2, window_bounds = array<i64: 128, 128>}, {pipeline_mode = #tpu.pipeline_mode<synchronous>, transform_indices = @transform_3, window_bounds = array<i64: 128, 128>}, {transform_indices = @transform_4, window_bounds = array<i64: 1>}, {transform_indices = @transform_5, window_bounds = array<i64: 1, 128>}]} {
    %c0 = arith.constant 0 : index
    %0 = memref.load %arg5[%c0] : memref<1xf32, #tpu.memory_space<smem>>
    %c0_i32 = arith.constant 0 : i32
    %c128_i32 = arith.constant 128 : i32
    %1 = arith.muli %c0_i32, %c128_i32 : i32
    %2 = tpu.assume_multiple %1, 128 : i32
    %c0_0 = arith.constant 0 : index
    %3 = arith.index_cast %2 : i32 to index
    %4 = vector.load %arg1[%c0_0, %3] : memref<4x128xf32, #tpu.memory_space<vmem>>, vector<4x128xf32>
    %c0_1 = arith.constant 0 : index
    %c0_2 = arith.constant 0 : index
    %c0_3 = arith.constant 0 : index
    %5 = vector.load %arg2[%c0_1, %c0_2, %c0_3] : memref<4x128x128xf32, #tpu.memory_space<vmem>>, vector<1x128x128xf32>
    %6 = vector.shape_cast %5 : vector<1x128x128xf32> to vector<128x128xf32>
    %7 = vector.extract_strided_slice %4 {offsets = [0, 0], sizes = [1, 128], strides = [1, 1]} : vector<4x128xf32> to vector<1x128xf32>
    %8 = vector.shape_cast %7 : vector<1x128xf32> to vector<1x128xf32>
    %9 = vector.broadcast %8 : vector<1x128xf32> to vector<128x128xf32>
    %10 = arith.mulf %6, %9 : vector<128x128xf32>
    %c1 = arith.constant 1 : index
    %c0_4 = arith.constant 0 : index
    %c0_5 = arith.constant 0 : index
    %11 = vector.load %arg2[%c1, %c0_4, %c0_5] : memref<4x128x128xf32, #tpu.memory_space<vmem>>, vector<1x128x128xf32>
    %12 = vector.shape_cast %11 : vector<1x128x128xf32> to vector<128x128xf32>
    %13 = vector.extract_strided_slice %4 {offsets = [1, 0], sizes = [1, 128], strides = [1, 1]} : vector<4x128xf32> to vector<1x128xf32>
    %14 = vector.shape_cast %13 : vector<1x128xf32> to vector<1x128xf32>
    %15 = vector.broadcast %14 : vector<1x128xf32> to vector<128x128xf32>
    %16 = arith.mulf %12, %15 : vector<128x128xf32>
    %17 = arith.addf %10, %16 : vector<128x128xf32>
    %c2 = arith.constant 2 : index
    %c0_6 = arith.constant 0 : index
    %c0_7 = arith.constant 0 : index
    %18 = vector.load %arg2[%c2, %c0_6, %c0_7] : memref<4x128x128xf32, #tpu.memory_space<vmem>>, vector<1x128x128xf32>
    %19 = vector.shape_cast %18 : vector<1x128x128xf32> to vector<128x128xf32>
    %20 = vector.extract_strided_slice %4 {offsets = [2, 0], sizes = [1, 128], strides = [1, 1]} : vector<4x128xf32> to vector<1x128xf32>
    %21 = vector.shape_cast %20 : vector<1x128xf32> to vector<1x128xf32>
    %22 = vector.broadcast %21 : vector<1x128xf32> to vector<128x128xf32>
    %23 = arith.mulf %19, %22 : vector<128x128xf32>
    %24 = arith.addf %17, %23 : vector<128x128xf32>
    %c3 = arith.constant 3 : index
    %c0_8 = arith.constant 0 : index
    %c0_9 = arith.constant 0 : index
    %25 = vector.load %arg2[%c3, %c0_8, %c0_9] : memref<4x128x128xf32, #tpu.memory_space<vmem>>, vector<1x128x128xf32>
    %26 = vector.shape_cast %25 : vector<1x128x128xf32> to vector<128x128xf32>
    %27 = vector.extract_strided_slice %4 {offsets = [3, 0], sizes = [1, 128], strides = [1, 1]} : vector<4x128xf32> to vector<1x128xf32>
    %28 = vector.shape_cast %27 : vector<1x128xf32> to vector<1x128xf32>
    %29 = vector.broadcast %28 : vector<1x128xf32> to vector<128x128xf32>
    %30 = arith.mulf %26, %29 : vector<128x128xf32>
    %31 = arith.addf %24, %30 : vector<128x128xf32>
    %c0_10 = arith.constant 0 : index
    %c0_11 = arith.constant 0 : index
    %32 = vector.load %arg3[%c0_10, %c0_11] : memref<128x128xf32, #tpu.memory_space<vmem>>, vector<128x128xf32>
    %33 = arith.addf %31, %32 : vector<128x128xf32>
    %cst = arith.constant 0.000000e+00 : f32
    %34 = vector.broadcast %cst : f32 to vector<128x128xf32>
    %35 = arith.maximumf %33, %34 : vector<128x128xf32>
    %c0_12 = arith.constant 0 : index
    %c0_13 = arith.constant 0 : index
    %36 = vector.load %arg4[%c0_12, %c0_13] : memref<128x128xf32, #tpu.memory_space<vmem>>, vector<128x128xf32>
    %37 = arith.mulf %35, %36 : vector<128x128xf32>
    %cst_14 = arith.constant dense<0.000000e+00> : vector<128xf32>
    %38 = vector.multi_reduction <add>, %37, %cst_14 [0] : vector<128x128xf32> to vector<128xf32>
    %39 = vector.shape_cast %38 : vector<128xf32> to vector<1x128xf32>
    %40 = vector.broadcast %0 : f32 to vector<1x128xf32>
    %41 = arith.addf %39, %40 : vector<1x128xf32>
    %c0_15 = arith.constant 0 : index
    %42 = arith.index_cast %2 : i32 to index
    %43 = vector.load %arg6[%c0_15, %42] : memref<1x128xf32, #tpu.memory_space<vmem>>, vector<1x128xf32>
    tpu.vector_store %arg6[%c0_15, %42], %41 {strides = array<i32>} : memref<1x128xf32, #tpu.memory_space<vmem>>, vector<1x128xf32>,
    %c1_i32 = arith.constant 1 : i32
    return
  }
  func.func @transform_0(%arg0: i32) -> (i32, i32) {
    %c0_i32 = arith.constant 0 : i32
    %c0_i32_0 = arith.constant 0 : i32
    return %c0_i32, %arg0 : i32, i32
  }
  func.func @transform_1(%arg0: i32) -> (i32, i32, i32) {
    %c0_i32 = arith.constant 0 : i32
    %c0_i32_0 = arith.constant 0 : i32
    %c0_i32_1 = arith.constant 0 : i32
    %c0_i32_2 = arith.constant 0 : i32
    return %c0_i32, %c0_i32_0, %c0_i32_1 : i32, i32, i32
  }
  func.func @transform_2(%arg0: i32) -> (i32, i32) {
    %c0_i32 = arith.constant 0 : i32
    %c0_i32_0 = arith.constant 0 : i32
    %c0_i32_1 = arith.constant 0 : i32
    return %c0_i32, %c0_i32_0 : i32, i32
  }
  func.func @transform_3(%arg0: i32) -> (i32, i32) {
    %c0_i32 = arith.constant 0 : i32
    %c0_i32_0 = arith.constant 0 : i32
    %c0_i32_1 = arith.constant 0 : i32
    return %c0_i32, %c0_i32_0 : i32, i32
  }
  func.func @transform_4(%arg0: i32) -> i32 {
    %c0_i32 = arith.constant 0 : i32
    %c0_i32_0 = arith.constant 0 : i32
    return %c0_i32 : i32
  }
  func.func @transform_5(%arg0: i32) -> (i32, i32) {
    %c0_i32 = arith.constant 0 : i32
    %c0_i32_0 = arith.constant 0 : i32
    return %c0_i32, %arg0 : i32, i32
  }
}

</mosaic_0001>

<bundles_post_ra>
// kernel: critic_forward.1
= control target key start
LH: loop header
LB: loop body
LE: loop exit
PB: predicated region body
PF: predicated region fallthrough
CT: control target
= control target key end

     0   :  { %v39_v0 = vlaneseq  ;;  %s791_s0 = inlined_call_operand.vmem [shape: f32[4,128], index: 0, kind: input, shape index: {}]   ;;  %s792_s1 = inlined_call_operand.vmem [shape: f32[4,128,128], index: 1, kind: input, shape index: {}]   ;;  %s793_s2 = inlined_call_operand.vmem [shape: f32[128,128], index: 2, kind: input, shape index: {}]   ;;  %s794_s3 = inlined_call_operand.vmem [shape: f32[128,128], index: 3, kind: input, shape index: {}]   ;;  %s795_s4 = inlined_call_operand.<no memory space> [shape: f32[1], index: 4, kind: input, shape index: {}]   ;;  %s796_s5 = inlined_call_operand.vmem [shape: f32[1,128], index: 5, kind: output, shape index: {}]  }
   0x1   :  { %v22_v4 = vld [vmem:[%s791_s0] sm:$0xf]  ;;  %v24_v7 = vld [vmem:[%s792_s1 + $0x8] sm:$0xff]  ;;  %v25_v8 = vld [vmem:[%s792_s1 + $0x10] sm:$0xff] }
   0x2   :  { %v40_v1 = vshrl.u32 %v39_v0, 7  ;;  %v23_v6 = vld [vmem:[%s792_s1] sm:$0xff]  ;;  %v26_v11 = vld [vmem:[%s792_s1 + $0x18] sm:$0xff]  ;;  %v327_v13 = vld [vmem:[%s792_s1 + $0x88] sm:$0xff] }
   0x3   :  { %v326_v12 = vld [vmem:[%s792_s1 + $0x80] sm:$0xff]  ;;  %v28_v16 = vld [vmem:[%s792_s1 + $0x28] sm:$0xff]  ;;  %v29_v17 = vld [vmem:[%s792_s1 + $0x30] sm:$0xff] }
   0x4   :  { %v41_v2 = vsub.s32 0, %v40_v1  ;;  %v78_v3 = vsub.s32 1, %v40_v1  ;;  %v131_v5 = vsub.s32 2, %v40_v1  ;;  %v184_v14 = vsub.s32 3, %v40_v1  ;;  %v27_v15 = vld [vmem:[%s792_s1 + $0x20] sm:$0xff]  ;;  %v30_v18 = vld [vmem:[%s792_s1 + $0x38] sm:$0xff] }
   0x5   :  { %v31_v19 = vld [vmem:[%s792_s1 + $0x40] sm:$0xff]  ;;  %v328_v20 = vld [vmem:[%s792_s1 + $0x90] sm:$0xff]  ;;  %v32_v22 = vld [vmem:[%s792_s1 + $0x48] sm:$0xff] }
   0x6   :  { %v42_v9 = vrot.slane %v22_v4, %v41_v2  ;;  %v416_v10 = vrot.slane %v22_v4, %v78_v3  ;;  %v445_v21 = vrot.slane %v22_v4, %v131_v5  ;;  %v33_v23 = vld [vmem:[%s792_s1 + $0x50] sm:$0xff]  ;;  %v329_v26 = vld [vmem:[%s792_s1 + $0x98] sm:$0xff]  ;;  %v342_v33 = vld [vmem:[%s792_s1 + $0x100] sm:$0xff]  ;;  %v467_v35 = vrot.slane %v22_v4, %v184_v14 }
   0x7   :  { %v34_v29 = vld [vmem:[%s792_s1 + $0x58] sm:$0xff]  ;;  %v343_v34 = vld [vmem:[%s792_s1 + $0x108] sm:$0xff]  ;;  %v35_v36 = vld [vmem:[%s792_s1 + $0x60] sm:$0xff] }
   0x8   :  { %v43_v24 = vmul.f32 %v42_v9, %v23_v6  ;;  %v44_v25 = vmul.f32 %v42_v9, %v24_v7  ;;  %v80_v27 = vmul.f32 %v326_v12, %v416_v10  ;;  %v81_v28 = vmul.f32 %v327_v13, %v416_v10  ;;  %v36_v37 = vld [vmem:[%s792_s1 + $0x68] sm:$0xff]  ;;  %v37_v38 = vld [vmem:[%s792_s1 + $0x70] sm:$0xff]  ;;  %v38_v43 = vld [vmem:[%s792_s1 + $0x78] sm:$0xff] }
   0x9   :  { %v45_v30 = vmul.f32 %v42_v9, %v25_v8  ;;  %v46_v31 = vmul.f32 %v42_v9, %v26_v11  ;;  %v47_v32 = vmul.f32 %v42_v9, %v27_v15  ;;  %v48_v39 = vmul.f32 %v42_v9, %v28_v16  ;;  %v330_v47 = vld [vmem:[%s792_s1 + $0xa0] sm:$0xff]  ;;  %v344_v49 = vld [vmem:[%s792_s1 + $0x110] sm:$0xff]  ;;  %v331_v50 = vld [vmem:[%s792_s1 + $0xa8] sm:$0xff] }
   0xa   :  { %v478_v40 = vmul.f32 %v42_v9, %v29_v17  ;;  %v480_v41 = vmul.f32 %v42_v9, %v30_v18  ;;  %v82_v42 = vmul.f32 %v328_v20, %v416_v10  ;;  %v486_v44 = vmul.f32 %v42_v9, %v31_v19  ;;  %v332_v51 = vld [vmem:[%s792_s1 + $0xb0] sm:$0xff]  ;;  %v345_v54 = vld [vmem:[%s792_s1 + $0x118] sm:$0xff]  ;;  %v358_v62 = vld [vmem:[%s792_s1 + $0x180] sm:$0xff] }
   0xb   :  { %v488_v45 = vmul.f32 %v42_v9, %v32_v22  ;;  %v490_v46 = vmul.f32 %v42_v9, %v33_v23  ;;  %v83_v48 = vmul.f32 %v329_v26, %v416_v10  ;;  %v96_v52 = vadd.f32 %v80_v27, %v43_v24  ;;  %v333_v61 = vld [vmem:[%s792_s1 + $0xb8] sm:$0xff]  ;;  %v359_v63 = vld [vmem:[%s792_s1 + $0x188] sm:$0xff]  ;;  %v334_v1 = vld [vmem:[%s792_s1 + $0xc0] sm:$0xff] }
   0xc   :  { %v97_v53 = vadd.f32 %v81_v28, %v44_v25  ;;  %v133_v55 = vmul.f32 %v342_v33, %v445_v21  ;;  %v134_v56 = vmul.f32 %v343_v34, %v445_v21  ;;  %v510_v57 = vmul.f32 %v42_v9, %v34_v29  ;;  %v335_v2 = vld [vmem:[%s792_s1 + $0xc8] sm:$0xff]  ;;  %v336_v3 = vld [vmem:[%s792_s1 + $0xd0] sm:$0xff]  ;;  %v346_v11 = vld [vmem:[%s792_s1 + $0x120] sm:$0xff] }
   0xd   :  { %v512_v58 = vmul.f32 %v42_v9, %v35_v36  ;;  %v514_v59 = vmul.f32 %v42_v9, %v36_v37  ;;  %v516_v60 = vmul.f32 %v42_v9, %v37_v38  ;;  %v527_v0 = vmul.f32 %v42_v9, %v38_v43  ;;  %v360_v13 = vld [vmem:[%s792_s1 + $0x190] sm:$0xff]  ;;  %v337_v14 = vld [vmem:[%s792_s1 + $0xd8] sm:$0xff]  ;;  %v338_v15 = vld [vmem:[%s792_s1 + $0xe0] sm:$0xff] }
   0xe   :  { %v84_v4 = vmul.f32 %v330_v47, %v416_v10  ;;  %v98_v5 = vadd.f32 %v82_v42, %v45_v30  ;;  %v135_v6 = vmul.f32 %v344_v49, %v445_v21  ;;  %v85_v7 = vmul.f32 %v331_v50, %v416_v10  ;;  %v347_v16 = vld [vmem:[%s792_s1 + $0x128] sm:$0xff]  ;;  %v361_v26 = vld [vmem:[%s792_s1 + $0x198] sm:$0xff]  ;;  %v340_v28 = vld [vmem:[%s792_s1 + $0xf0] sm:$0xff] }
   0xf   :  { %v86_v8 = vmul.f32 %v332_v51, %v416_v10  ;;  %v99_v9 = vadd.f32 %v83_v48, %v46_v31  ;;  %v136_v12 = vmul.f32 %v345_v54, %v445_v21  ;;  %v149_v17 = vadd.f32 %v133_v55, %v96_v52  ;;  %v339_v27 = vld [vmem:[%s792_s1 + $0xe8] sm:$0xff]  ;;  %v341_v29 = vld [vmem:[%s792_s1 + $0xf8] sm:$0xff]  ;;  %v348_v42 = vld [vmem:[%s792_s1 + $0x130] sm:$0xff] }
  0x10   :  { %v150_v18 = vadd.f32 %v134_v56, %v97_v53  ;;  %v186_v19 = vmul.f32 %v358_v62, %v467_v35  ;;  %v187_v20 = vmul.f32 %v359_v63, %v467_v35  ;;  %v87_v22 = vmul.f32 %v333_v61, %v416_v10  ;;  %v349_v47 = vld [vmem:[%s792_s1 + $0x138] sm:$0xff]  ;;  %v363_v55 = vld [vmem:[%s792_s1 + $0x1a8] sm:$0xff]  ;;  %v218_v56 = vld [vmem:[%s793_s2] sm:$0xff] }
  0x11   :  { %v88_v23 = vmul.f32 %v334_v1, %v416_v10  ;;  %v89_v24 = vmul.f32 %v335_v2, %v416_v10  ;;  %v90_v25 = vmul.f32 %v336_v3, %v416_v10  ;;  %v100_v30 = vadd.f32 %v84_v4, %v47_v32  ;;  %v362_v32 = vld [vmem:[%s792_s1 + $0x1a0] sm:$0xff]  ;;  %v219_v61 = vld [vmem:[%s793_s2 + $0x8] sm:$0xff] }
  0x12   :  { %v137_v31 = vmul.f32 %v346_v11, %v445_v21  ;;  %v151_v33 = vadd.f32 %v135_v6, %v98_v5  ;;  %v188_v34 = vmul.f32 %v360_v13, %v467_v35  ;;  %v91_v36 = vmul.f32 %v337_v14, %v416_v10  ;;  %v350_v62 = vld [vmem:[%s792_s1 + $0x140] sm:$0xff]  ;;  %v364_v6 = vld [vmem:[%s792_s1 + $0x1b0] sm:$0xff] }
  0x13   :  { %v92_v37 = vmul.f32 %v338_v15, %v416_v10  ;;  %v101_v38 = vadd.f32 %v85_v7, %v48_v39  ;;  %v138_v43 = vmul.f32 %v347_v16, %v445_v21  ;;  %v152_v48 = vadd.f32 %v136_v12, %v99_v9  ;;  %v220_v7 = vld [vmem:[%s793_s2 + $0x10] sm:$0xff] }
  0x14   :  { %v189_v49 = vmul.f32 %v361_v26, %v467_v35  ;;  %v202_v50 = vadd.f32 %v186_v19, %v149_v17  ;;  %v203_v51 = vadd.f32 %v187_v20, %v150_v18  ;;  %v93_v39 = vmul.f32 %v339_v27, %v416_v10  ;;  %v221_v17 = vld [vmem:[%s793_s2 + $0x18] sm:$0xff]  ;;  %v352_v18 = vld [vmem:[%s792_s1 + $0x150] sm:$0xff]  ;;  %v222_v26 = vld [vmem:[%s793_s2 + $0x20] sm:$0xff] }
  0x15   :  { %v94_v52 = vmul.f32 %v340_v28, %v416_v10  ;;  %v594_v53 = vmul.f32 %v341_v29, %v416_v10  ;;  %v102_v54 = vadd.f32 %v86_v8, %v478_v40  ;;  %v139_v10 = vmul.f32 %v348_v42, %v445_v21  ;;  %v351_v8 = vld [vmem:[%s792_s1 + $0x148] sm:$0xff]  ;;  %v353_v27 = vld [vmem:[%s792_s1 + $0x158] sm:$0xff]  ;;  %v266_v42 = vld [vmem:[%s794_s3] sm:$0xff] }
  0x16   :  { %v153_v63 = vadd.f32 %v137_v31, %v100_v30  ;;  %v190_v40 = vmul.f32 %v362_v32, %v467_v35  ;;  %v204_v1 = vadd.f32 %v188_v34, %v151_v33  ;;  %v103_v2 = vadd.f32 %v87_v22, %v480_v41  ;;  %v365_v41 = vld [vmem:[%s792_s1 + $0x1b8] sm:$0xff] }
  0x17   :  { %v104_v3 = vadd.f32 %v88_v23, %v486_v44  ;;  %v140_v4 = vmul.f32 %v349_v47, %v445_v21  ;;  %v154_v5 = vadd.f32 %v138_v43, %v101_v38  ;;  %v191_v44 = vmul.f32 %v363_v55, %v467_v35  ;;  %v223_v38 = vld [vmem:[%s793_s2 + $0x28] sm:$0xff]  ;;  %v268_v55 = vld [vmem:[%s794_s3 + $0x10] sm:$0xff] }
  0x18   :  { %v205_v9 = vadd.f32 %v189_v49, %v152_v48  ;;  %v234_v11 = vadd.f32 %v218_v56, %v202_v50  ;;  %v235_v12 = vadd.f32 %v219_v61, %v203_v51  ;;  %v105_v13 = vadd.f32 %v89_v24, %v488_v45  ;;  %v366_v24 = vld [vmem:[%s792_s1 + $0x1c0] sm:$0xff]  ;;  %v267_v43 = vld [vmem:[%s794_s3 + $0x8] sm:$0xff]  ;;  %v369_v61 = vld [vmem:[%s792_s1 + $0x1d8] sm:$0xff] }
  0x19   :  { %v106_v14 = vadd.f32 %v90_v25, %v490_v46  ;;  %v107_v15 = vadd.f32 %v91_v36, %v510_v57  ;;  %v141_v16 = vmul.f32 %v350_v62, %v445_v21  ;;  %v155_v19 = vadd.f32 %v139_v10, %v102_v54  ;;  %v224_v54 = vld [vmem:[%s793_s2 + $0x30] sm:$0xff]  ;;  %v355_v56 = vld [vmem:[%s792_s1 + $0x168] sm:$0xff] }
  0x1a   :  { %v192_v20 = vmul.f32 %v364_v6, %v467_v35  ;;  %v206_v22 = vadd.f32 %v190_v40, %v153_v63  ;;  %v236_v23 = vadd.f32 %v220_v7, %v204_v1  ;;  %v108_v45 = vadd.f32 %v92_v37, %v512_v58  ;;  %v367_v58 = vld [vmem:[%s792_s1 + $0x1c8] sm:$0xff]  ;;  %v269_v6 = vld [vmem:[%s794_s3 + $0x18] sm:$0xff]  ;;  %v356_v7 = vld [vmem:[%s792_s1 + $0x170] sm:$0xff] }
  0x1b   :  { %v142_v46 = vmul.f32 %v351_v8, %v445_v21  ;;  %v156_v57 = vadd.f32 %v140_v4, %v103_v2  ;;  %v193_v25 = vmul.f32 %v365_v41, %v467_v35  ;;  %v207_v28 = vadd.f32 %v191_v44, %v154_v5  ;;  %v225_v5 = vld [vmem:[%s793_s2 + $0x38] sm:$0xff] }
  0x1c   :  { %v237_v29 = vadd.f32 %v221_v17, %v205_v9  ;;  %v250_v30 = vmax.f32 %v234_v11, 0.0  ;;  %v251_v31 = vmax.f32 %v235_v12, 0.0  ;;  %v109_v33 = vadd.f32 %v93_v39, %v514_v59  ;;  %v354_v59 = vld [vmem:[%s792_s1 + $0x160] sm:$0xff]  ;;  %v357_v17 = vld [vmem:[%s792_s1 + $0x178] sm:$0xff] }
  0x1d   :  { %v655_v34 = vadd.f32 %v94_v52, %v516_v60  ;;  %v143_v36 = vmul.f32 %v352_v18, %v445_v21  ;;  %v157_v37 = vadd.f32 %v141_v16, %v104_v3  ;;  %v368_v60 = vld [vmem:[%s792_s1 + $0x1d0] sm:$0xff]  ;;  %v194_v32 = vmul.f32 %v366_v24, %v467_v35  ;;  %v270_v16 = vld [vmem:[%s794_s3 + $0x20] sm:$0xff]  ;;  %v371_v18 = vld [vmem:[%s792_s1 + $0x1e8] sm:$0xff] }
  0x1e   :  { %v208_v47 = vadd.f32 %v192_v20, %v155_v19  ;;  %v238_v48 = vadd.f32 %v222_v26, %v206_v22  ;;  %v252_v49 = vmax.f32 %v236_v23, 0.0  ;;  %v144_v50 = vmul.f32 %v353_v27, %v445_v21  ;;  %v271_v26 = vld [vmem:[%s794_s3 + $0x28] sm:$0xff]  ;;  %v372_v27 = vld [vmem:[%s792_s1 + $0x1f0] sm:$0xff] }
  0x1f   :  { %v158_v51 = vadd.f32 %v142_v46, %v105_v13  ;;  %v195_v39 = vmul.f32 %v367_v58, %v467_v35  ;;  %v209_v52 = vadd.f32 %v193_v25, %v156_v57  ;;  %v239_v62 = vadd.f32 %v223_v38, %v207_v28  ;;  %v227_v25 = vld [vmem:[%s793_s2 + $0x48] sm:$0xff]  ;;  %v228_v38 = vld [vmem:[%s793_s2 + $0x50] sm:$0xff] }
  0x20   :  { %v253_v10 = vmax.f32 %v237_v29, 0.0  ;;  %v282_v63 = vmul.f32 %v266_v42, %v250_v30  ;;  %v283_v40 = vmul.f32 %v267_v43, %v251_v31  ;;  %v111_v1 = vadd.f32 %v594_v53, %v527_v0  ;;  %v370_v0 = vld [vmem:[%s792_s1 + $0x1e0] sm:$0xff]  ;;  %v272_v42 = vld [vmem:[%s794_s3 + $0x30] sm:$0xff]  ;;  %v373_v43 = vld [vmem:[%s792_s1 + $0x1f8] sm:$0xff] }
  0x21   :  { %v145_v2 = vmul.f32 %v354_v59, %v445_v21  ;;  %v159_v3 = vadd.f32 %v143_v36, %v106_v14  ;;  %v196_v4 = vmul.f32 %v368_v60, %v467_v35  ;;  %v210_v53 = vadd.f32 %v194_v32, %v157_v37  ;;  %v226_v14 = vld [vmem:[%s793_s2 + $0x40] sm:$0xff] }
  0x22   :  { %v240_v8 = vadd.f32 %v224_v54, %v208_v47  ;;  %v254_v41 = vmax.f32 %v238_v48, 0.0  ;;  %v284_v44 = vmul.f32 %v268_v55, %v252_v49  ;;  %v146_v9 = vmul.f32 %v355_v56, %v445_v21  ;;  %v229_v49 = vld [vmem:[%s793_s2 + $0x58] sm:$0xff] }
  0x23   :  { %v160_v11 = vadd.f32 %v144_v50, %v107_v15  ;;  %v197_v12 = vmul.f32 %v369_v61, %v467_v35  ;;  %v211_v13 = vadd.f32 %v195_v39, %v158_v51  ;;  %v241_v15 = vadd.f32 %v225_v5, %v209_v52  ;;  %v273_v50 = vld [vmem:[%s794_s3 + $0x38] sm:$0xff] }
  0x24   :  { %v255_v19 = vmax.f32 %v239_v62, 0.0  ;;  %v285_v20 = vmul.f32 %v269_v6, %v253_v10  ;;  %v298_v22 = vadd.f32 %v283_v40, %v282_v63  ;;  %v147_v23 = vmul.f32 %v356_v7, %v445_v21  ;;  %v274_v62 = vld [vmem:[%s794_s3 + $0x40] sm:$0xff] }
  0x25   :  { %v161_v46 = vadd.f32 %v145_v2, %v108_v45  ;;  %v198_v57 = vmul.f32 %v370_v0, %v467_v35  ;;  %v212_v24 = vadd.f32 %v196_v4, %v159_v3  ;;  %v242_v58 = vadd.f32 %v226_v14, %v210_v53  ;;  %v232_v53 = vld [vmem:[%s793_s2 + $0x70] sm:$0xff] }
  0x26   :  { %v256_v28 = vmax.f32 %v240_v8, 0.0  ;;  %v286_v29 = vmul.f32 %v270_v16, %v254_v41  ;;  %v299_v30 = vadd.f32 %v298_v22, %v284_v44  ;;  %v148_v45 = vmul.f32 %v357_v17, %v445_v21  ;;  %v276_v8 = vld [vmem:[%s794_s3 + $0x50] sm:$0xff] }
  0x27   :  { %v162_v31 = vadd.f32 %v146_v9, %v109_v33  ;;  %v199_v36 = vmul.f32 %v371_v18, %v467_v35  ;;  %v213_v37 = vadd.f32 %v197_v12, %v160_v11  ;;  %v243_v59 = vadd.f32 %v227_v25, %v211_v13  ;;  %v233_v12 = vld [vmem:[%s793_s2 + $0x78] sm:$0xff] }
  0x28   :  { %v257_v60 = vmax.f32 %v241_v15, 0.0  ;;  %v287_v32 = vmul.f32 %v271_v26, %v255_v19  ;;  %v300_v21 = vadd.f32 %v299_v30, %v285_v20  ;;  %v163_v33 = vadd.f32 %v147_v23, %v655_v34  ;;  %v230_v34 = vld [vmem:[%s793_s2 + $0x60] sm:$0xff]  ;;  %v277_v13 = vld [vmem:[%s794_s3 + $0x58] sm:$0xff]  ;;  %v280_v26 = vld [vmem:[%s794_s3 + $0x70] sm:$0xff] }
  0x29   :  { %v200_v47 = vmul.f32 %v372_v27, %v467_v35  ;;  %v214_v48 = vadd.f32 %v198_v57, %v161_v46  ;;  %v244_v51 = vadd.f32 %v228_v38, %v212_v24  ;;  %v258_v39 = vmax.f32 %v242_v58, 0.0  ;;  %v278_v15 = vld [vmem:[%s794_s3 + $0x60] sm:$0xff]  ;;  %v279_v46 = vld [vmem:[%s794_s3 + $0x68] sm:$0xff] }
  0x2a   :  { %v288_v52 = vmul.f32 %v272_v42, %v256_v28  ;;  %v301_v54 = vadd.f32 %v300_v21, %v286_v29  ;;  %v164_v55 = vadd.f32 %v148_v45, %v111_v1  ;;  %v201_v56 = vmul.f32 %v373_v43, %v467_v35  ;;  %v231_v1 = vld [vmem:[%s793_s2 + $0x68] sm:$0xff]  ;;  %v281_v29 = vld [vmem:[%s794_s3 + $0x78] sm:$0xff] }
  0x2b   :  { %v215_v61 = vadd.f32 %v199_v36, %v162_v31  ;;  %v245_v10 = vadd.f32 %v229_v49, %v213_v37  ;;  %v259_v63 = vmax.f32 %v243_v59, 0.0  ;;  %v289_v40 = vmul.f32 %v273_v50, %v257_v60  ;;  %v275_v35 = vld [vmem:[%s794_s3 + $0x48] sm:$0xff] }
  0x2c   :  { %v302_v2 = vadd.f32 %v301_v54, %v287_v32  ;;  %v216_v3 = vadd.f32 %v200_v47, %v163_v33  ;;  %v246_v4 = vadd.f32 %v230_v34, %v214_v48  ;;  %v260_v5 = vmax.f32 %v244_v51, 0.0 }
  0x2d   :  { %v290_v6 = vmul.f32 %v274_v62, %v258_v39  ;;  %v217_v0 = vadd.f32 %v201_v56, %v164_v55  ;;  %v247_v41 = vadd.f32 %v231_v1, %v215_v61  ;;  %v261_v44 = vmax.f32 %v245_v10, 0.0 }
  0x2e   :  { %v303_v7 = vadd.f32 %v302_v2, %v288_v52  ;;  %v291_v9 = vmul.f32 %v275_v35, %v259_v63  ;;  %v248_v14 = vadd.f32 %v232_v53, %v216_v3  ;;  %v262_v16 = vmax.f32 %v246_v4, 0.0 }
  0x2f   :  { %v292_v17 = vmul.f32 %v276_v8, %v260_v5  ;;  %v249_v19 = vadd.f32 %v233_v12, %v217_v0  ;;  %v263_v20 = vmax.f32 %v247_v41, 0.0  ;;  %v293_v22 = vmul.f32 %v277_v13, %v261_v44 }
  0x30   :  { %v304_v11 = vadd.f32 %v303_v7, %v289_v40  ;;  %v264_v57 = vmax.f32 %v248_v14, 0.0  ;;  %v294_v24 = vmul.f32 %v278_v15, %v262_v16  ;;  %v319_v21 = vstv %s795_s4 }
  0x31   :  { %v265_v27 = vmax.f32 %v249_v19, 0.0  ;;  %v295_v58 = vmul.f32 %v279_v46, %v263_v20 }
  0x32   :  { %v305_v18 = vadd.f32 %v304_v11, %v290_v6  ;;  %v296_v30 = vmul.f32 %v280_v26, %v264_v57 }
  0x33   :  { %v297_v31 = vmul.f32 %v281_v29, %v265_v27 }
  0x34   :  { %v306_v23 = vadd.f32 %v305_v18, %v291_v9 }
  0x36   :  { %v307_v25 = vadd.f32 %v306_v23, %v292_v17 }
  0x38   :  { %v308_v28 = vadd.f32 %v307_v25, %v293_v22 }
  0x3a   :  { %v309_v45 = vadd.f32 %v308_v28, %v294_v24 }
  0x3c   :  { %v310_v36 = vadd.f32 %v309_v45, %v295_v58 }
  0x3e   :  { %v311_v37 = vadd.f32 %v310_v36, %v296_v30 }
  0x40   :  { %v312_v38 = vadd.f32 %v311_v37, %v297_v31 }
  0x42   :  { %v313_v42 = vrot.slane %v312_v38, 4 }
  0x44   :  { %v314_v43 = vadd.f32 %v313_v42, %v312_v38 }
  0x46   :  { %v315_v59 = vrot.slane %v314_v43, 2 }
  0x48   :  { %v316_v60 = vadd.f32 %v315_v59, %v314_v43 }
  0x4a   :  { %v317_v32 = vrot.slane %v316_v60, 1 }
  0x4c   :  { %v318_v33 = vadd.f32 %v317_v32, %v316_v60 }
  0x4e   :  { %v320_v47 = vadd.f32 %v319_v21, %v318_v33 }
  0x50   :  { %321 = vst [vmem:[%s796_s5] sm:$0x1] %v320_v47 }

</bundles_post_ra>
